<compile_context>
chip_gen: v5e
topology: v5e:2x2
jax: 0.10.0
libtpu: 0.0.40
codegen_flags: <defaults>
</compile_context>

<pallas_src>
import functools

import jax
import jax.numpy as jnp
from jax import lax
from jax.experimental import pallas as pl
from jax.experimental.pallas import tpu as pltpu


# ----------------------------- hardware helpers ------------------------------

@functools.lru_cache(maxsize=None)
def _device_kind():
    try:
        return jax.devices()[0].device_kind.lower()
    except Exception:
        return ""


@functools.lru_cache(maxsize=None)
def _tpu_vmem_capacity():
    """Physical VMEM per TensorCore in bytes (best effort, conservative fallback)."""
    try:
        info = pltpu.get_tpu_info()
        cap = getattr(info, "vmem_capacity_bytes", None)
        if cap:
            return int(cap)
    except Exception:
        pass
    kind = _device_kind()
    if not kind:
        return 64 << 20            # unknown -> assume the smallest (v7x-sized)
    if "7" in kind:
        return 64 << 20            # v7x: 64 MiB per TensorCore
    return 128 << 20               # v5e / v6e: 128 MiB


@functools.lru_cache(maxsize=None)
def _eup_supports_bf16():
    """bf16 transcendentals are fast on v6e/v7x; keep exp in f32 on v5e/older."""
    kind = _device_kind()
    if not kind:
        return False
    return not any(tag in kind for tag in ("v2", "v3", "v4", "v5"))


def _padded_f32_bytes(shape):
    """VMEM footprint of an f32 scratch including (8,128) sublane/lane padding."""
    shape = tuple(int(d) for d in shape)
    if len(shape) == 1:
        shape = (1,) + shape
    lead = 1
    for d in shape[:-2]:
        lead *= d
    sub = -(-shape[-2] // 8) * 8
    lane = -(-shape[-1] // 128) * 128
    return lead * sub * lane * 4


def _vmem_limit_bytes(block_bytes, scratch_bytes=0):
    """Double-buffered blocks + padded scratch + slack, clamped per generation."""
    need = 2 * int(block_bytes) + int(scratch_bytes) + (4 << 20)
    need = max(need, 32 << 20)
    usable = int(_tpu_vmem_capacity() * 0.85)   # leave headroom for internal scratch
    return int(min(need, usable))


def _pick_tile(n, target):
    """Largest multiple of 128 that divides n and is <= target; else n (full)."""
    n = int(n)
    upper = (min(int(target), n) // 128) * 128
    for t in range(upper, 0, -128):
        if n % t == 0:
            return t
    return n


# ----------------------------- tiled linear ---------------------------------

def _linear_kernel(x_ref, w_ref, b_ref, o_ref):
    # y = x @ w + b : bf16 MXU inputs, f32 accumulation, f32 bias add.
    acc = jnp.dot(x_ref[...].astype(jnp.bfloat16),
                  w_ref[...].astype(jnp.bfloat16),
                  preferred_element_type=jnp.float32)
    o_ref[...] = (acc + b_ref[...].astype(jnp.float32)).astype(o_ref.dtype)


def linear(x, w, b, *, out_dtype=None, tile_m=None, tile_n=512):
    """x: (M, K) @ w: (K, N) + b: (N,) -> (M, N), tiled over M and N."""
    M, K = x.shape
    N = w.shape[1]
    out_dtype = x.dtype if out_dtype is None else out_dtype
    if tile_m is None:
        # Larger resident x-tiles cut repeated weight DMA on 128-MiB chips;
        # keep tiles modest on v7x (64 MiB VMEM, 3.2 TB/s HBM).
        tile_m = 1024 if _tpu_vmem_capacity() >= (96 << 20) else 512
    tm = M if M <= tile_m else tile_m          # full dim or 8-aligned tile
    tn = N if N <= tile_n else tile_n          # full dim or 128-aligned tile

    block_bytes = (tm * K * jnp.dtype(x.dtype).itemsize
                   + K * tn * jnp.dtype(w.dtype).itemsize
                   + tn * jnp.dtype(b.dtype).itemsize
                   + tm * tn * jnp.dtype(out_dtype).itemsize)

    return pl.pallas_call(
        _linear_kernel,
        out_shape=jax.ShapeDtypeStruct((M, N), out_dtype),
        grid=(pl.cdiv(M, tm), pl.cdiv(N, tn)),
        in_specs=[
            pl.BlockSpec((tm, K), lambda i, j: (i, 0)),   # x tile resident across j
            pl.BlockSpec((K, tn), lambda i, j: (0, j)),
            pl.BlockSpec((1, tn), lambda i, j: (0, j)),
        ],
        out_specs=pl.BlockSpec((tm, tn), lambda i, j: (i, j)),
        compiler_params=pltpu.CompilerParams(
            dimension_semantics=("parallel", "parallel"),
            vmem_limit_bytes=_vmem_limit_bytes(block_bytes),
        ),
    )(x, w, b.reshape(1, N))


# ------------------------- fused multi-head attention ------------------------

def _attn_kernel(r_ref, k_ref, v_ref, o_ref, m_sc, l_sc, acc_sc, *, head, hd, bf16_exp):
    ki = pl.program_id(2)
    nkv = pl.num_programs(2)

    @pl.when(ki == 0)
    def _():
        m_sc[...] = jnp.full_like(m_sc, -jnp.inf)
        l_sc[...] = jnp.zeros_like(l_sc)
        acc_sc[...] = jnp.zeros_like(acc_sc)

    # scale is pre-folded (as sqrt(scale)) into the r columns of the rv
    # projection, so there is no per-kv-step rescale here.
    r_all = r_ref[0].astype(jnp.bfloat16)      # (tq,  dim)  queries, all heads
    k_all = k_ref[0].astype(jnp.bfloat16)      # (tkv, dim)  keys,    all heads
    v_all = v_ref[0].astype(jnp.bfloat16)      # (tkv, dim)  values,  all heads

    # TODO(synk): for hd in {64, 80} the per-head lane slices are not 128-aligned;
    # a head-pair / head-padded layout would cut the per-head XLU relayouts but is
    # left out to keep the kernel shape-generic.
    for h in range(head):                      # static unroll (head is small)
        lo = h * hd
        q_h = r_all[:, lo:lo + hd]             # (tq,  hd)
        k_h = k_all[:, lo:lo + hd]             # (tkv, hd)
        v_h = v_all[:, lo:lo + hd]             # (tkv, hd)
        # Contract last dims directly (no materialized k^T), f32 accumulation.
        s = lax.dot_general(q_h, k_h, (((1,), (1,)), ((), ())),
                            preferred_element_type=jnp.float32)   # (tq, tkv)
        m_prev = m_sc[h]                                            # (tq, 1)
        m_new = jnp.maximum(m_prev, jnp.max(s, axis=-1, keepdims=True))
        alpha = jnp.exp(m_prev - m_new)
        if bf16_exp:
            # v6e/v7x: EUP has a bf16 path; p is cast down for the PV matmul anyway.
            p = jnp.exp((s - m_new).astype(jnp.bfloat16))
            p_sum = jnp.sum(p.astype(jnp.float32), axis=-1, keepdims=True)
        else:
            # v5e: no bf16 EUP path -> keep exp in f32.
            p = jnp.exp(s - m_new)
            p_sum = jnp.sum(p, axis=-1, keepdims=True)
        l_sc[h] = alpha * l_sc[h] + p_sum
        acc_sc[h] = alpha * acc_sc[h] + jnp.dot(
            p.astype(jnp.bfloat16), v_h, preferred_element_type=jnp.float32)
        m_sc[h] = m_new

    @pl.when(ki == nkv - 1)
    def _():
        # Exact reciprocal (runs once per output tile, effectively free); single
        # lane-dense (tq, dim) store in exactly the layout the proj consumes.
        outs = [acc_sc[h] * pl.reciprocal(l_sc[h], approx=False) for h in range(head)]
        o_ref[0] = jnp.concatenate(outs, axis=-1).astype(o_ref.dtype)


def attention_core(rv3, head, *, tile_q=512, tile_kv=512):
    """rv3: (B, N, 2*dim) fused r|v activation -> (B, N, dim) attention output.

    Column layout of rv3 (from nn.Linear(dim, 2*dim) + reshape (B,N,2,head,hd)):
    [r_head0 | ... | r_head{h-1} | v_head0 | ... | v_head{h-1}], so the r/v and
    per-head splits are pure DMA addressing (BlockSpec index_map), no transposes.
    """
    B, N, two_dim = rv3.shape
    dim = two_dim // 2
    hd = dim // head

    # Largest 128-multiple divisors of N (full N only when N has no such divisor,
    # e.g. windowed attention with N=196 — small enough to fit anyway).
    tq = _pick_tile(N, tile_q)
    tkv = _pick_tile(N, tile_kv)
    nq = N // tq
    nkv = N // tkv

    kern = functools.partial(_attn_kernel, head=head, hd=hd,
                             bf16_exp=_eup_supports_bf16())

    in_itemsize = jnp.dtype(rv3.dtype).itemsize
    block_bytes = (tq * dim + 2 * tkv * dim + tq * dim) * in_itemsize
    scratch_bytes = (2 * _padded_f32_bytes((head, tq, 1))        # m, l (lane-padded)
                     + _padded_f32_bytes((head, tq, hd)))        # acc (lane-padded)

    if dim % 128 == 0:
        # Lane-aligned: slice the r / v column halves straight out of rv.
        inputs = (rv3, rv3, rv3)
        r_spec = pl.BlockSpec((1, tq, dim), lambda b, qi, ki: (b, qi, 0))
        k_spec = pl.BlockSpec((1, tkv, dim), lambda b, qi, ki: (b, ki, 0))
        v_spec = pl.BlockSpec((1, tkv, dim), lambda b, qi, ki: (b, ki, 1))
    else:
        # Fallback for lane-misaligned dim: split once on the host.
        r3 = rv3[:, :, :dim]
        v3 = rv3[:, :, dim:]
        inputs = (r3, r3, v3)
        r_spec = pl.BlockSpec((1, tq, dim), lambda b, qi, ki: (b, qi, 0))
        k_spec = pl.BlockSpec((1, tkv, dim), lambda b, qi, ki: (b, ki, 0))
        v_spec = pl.BlockSpec((1, tkv, dim), lambda b, qi, ki: (b, ki, 0))

    # NOTE: if profiling shows the (now bf16) k/v DMAs exposed, add
    # pipeline_mode=pl.Buffered(3) on k_spec/v_spec — VMEM headroom exists.
    return pl.pallas_call(
        kern,
        out_shape=jax.ShapeDtypeStruct((B, N, dim), rv3.dtype),
        grid=(B, nq, nkv),                       # kv (reduction) axis last
        in_specs=[r_spec, k_spec, v_spec],
        out_specs=pl.BlockSpec((1, tq, dim), lambda b, qi, ki: (b, qi, 0)),
        scratch_shapes=[
            pltpu.VMEM((head, tq, 1), jnp.float32),    # running max per head
            pltpu.VMEM((head, tq, 1), jnp.float32),    # running denominator per head
            pltpu.VMEM((head, tq, hd), jnp.float32),   # running numerator per head
        ],
        compiler_params=pltpu.CompilerParams(
            dimension_semantics=("parallel", "parallel", "arbitrary"),
            vmem_limit_bytes=_vmem_limit_bytes(block_bytes, scratch_bytes),
        ),
    )(*inputs)


# ------------------------------- forward pass --------------------------------

def attention_vpt(x, w_rv, b_rv, w_proj, b_proj, head):
    """Pallas forward equivalent of Attention_vpt.forward.  x: (B, H, W, dim)."""
    B, H, W, dim = x.shape
    N = H * W
    hd = dim // head

    # One-time parameter transforms (zero runtime cost):
    #  * The module computes (r * scale) @ r^T with the SAME r as query and key,
    #    so folding sqrt(scale)=hd**-0.25 into the r-half columns of the rv
    #    projection reproduces the single `scale` factor exactly and removes the
    #    per-kv-step rescale from the kernel.
    #  * Weights are cast to bf16 once (MXU runs at bf16 rate on v5e/v6e/v7x).
    rscale = jnp.float32(hd) ** jnp.float32(-0.25)
    col_scale = jnp.concatenate([jnp.full((dim,), rscale, jnp.float32),
                                 jnp.ones((dim,), jnp.float32)])
    w_rv_bf = (w_rv.astype(jnp.float32) * col_scale).astype(jnp.bfloat16)
    b_rv_f = b_rv.astype(jnp.float32) * col_scale
    w_proj_bf = w_proj.astype(jnp.bfloat16)
    b_proj_f = b_proj.astype(jnp.float32)

    rv = linear(x.reshape(B * N, dim), w_rv_bf, b_rv_f,
                out_dtype=jnp.bfloat16)                               # (B*N, 2*dim)
    o = attention_core(rv.reshape(B, N, 2 * dim), head)               # (B, N, dim) bf16
    out = linear(o.reshape(B * N, dim), w_proj_bf, b_proj_f,
                 out_dtype=x.dtype)                                   # (B*N, dim)
    return out.reshape(B, H, W, dim)                                  # reshapes only


def attention_vpt_ref(x, w_rv, b_rv, w_proj, b_proj, head):
    """Pure-JAX f32 reference (mirrors the PyTorch semantics exactly)."""
    B, H, W, dim = x.shape
    hd = dim // head
    N = H * W
    scale = hd ** (-0.5)
    rv = x.reshape(B * N, dim) @ w_rv + b_rv
    rv = rv.reshape(B, N, 2, head, hd).transpose(2, 0, 3, 1, 4).reshape(2, B * head, N, hd)
    r, v = rv[0], rv[1]
    attn = jnp.einsum("bnd,bmd->bnm", r * scale, r)
    attn = jax.nn.softmax(attn, axis=-1)
    o = jnp.einsum("bnm,bmd->bnd", attn, v)
    o = o.reshape(B, head, H, W, hd).transpose(0, 2, 3, 1, 4).reshape(B * N, dim)
    return (o @ w_proj + b_proj).reshape(B, H, W, dim)


# ---------------------------------- driver -----------------------------------

if __name__ == "__main__":
    # dim=128 keeps the r/v column BlockSpec lane-aligned (real SAM dims 768/1024/
    # 1280 are all multiples of 128); shapes are kept small for the demo.
    B, H, W, dim, head = 2, 8, 8, 128, 4

    key = jax.random.PRNGKey(0)
    k1, k2, k3, k4, k5 = jax.random.split(key, 5)
    x = jax.random.normal(k1, (B, H, W, dim), dtype=jnp.float32)
    # Synthetic params with nn.Linear(dim, 2*dim) / nn.Linear(dim, dim) shapes.
    w_rv = jax.random.normal(k2, (dim, 2 * dim), dtype=jnp.float32) * 0.05
    b_rv = jax.random.normal(k3, (2 * dim,), dtype=jnp.float32) * 0.05
    w_proj = jax.random.normal(k4, (dim, dim), dtype=jnp.float32) * 0.05
    b_proj = jax.random.normal(k5, (dim,), dtype=jnp.float32) * 0.05

    out = attention_vpt(x, w_rv, b_rv, w_proj, b_proj, head)
    out = jax.block_until_ready(out)

    ref = attention_vpt_ref(x, w_rv, b_rv, w_proj, b_proj, head)
    assert out.shape == (B, H, W, dim)
    max_err = float(jnp.max(jnp.abs(out.astype(jnp.float32) - ref)))
    # Tolerance covers the bf16 MXU inputs / bf16 intermediate activations
    # (accepted inference tradeoff) vs. the f32 reference.
    assert jnp.allclose(out.astype(jnp.float32), ref, atol=3e-2, rtol=3e-2), (
        f"mismatch vs ref (max abs err {max_err})")
    print("KERNEL_OK")
</pallas_src>

<mosaic_0001>
module attributes {stable_mosaic.version = 11 : i64} {
  func.func @_linear_kernel(%arg0: i32, %arg1: i32, %arg2: memref<128x128xf32, #tpu.memory_space<vmem>>, %arg3: memref<128x256xbf16, #tpu.memory_space<vmem>>, %arg4: memref<1x256xf32, #tpu.memory_space<vmem>>, %arg5: memref<128x256xbf16, #tpu.memory_space<vmem>>) attributes {dimension_semantics = [#tpu.dimension_semantics<parallel>, #tpu.dimension_semantics<parallel>], iteration_bounds = array<i64: 1, 1>, scalar_prefetch = 0 : i64, scratch_operands = 0 : i64, tpu.core_type = #tpu.core_type<tc>, window_params = [{transform_indices = @transform_0, window_bounds = array<i64: 128, 128>}, {transform_indices = @transform_1, window_bounds = array<i64: 128, 256>}, {transform_indices = @transform_2, window_bounds = array<i64: 1, 256>}, {transform_indices = @transform_3, window_bounds = array<i64: 128, 256>}]} {
    %c0 = arith.constant 0 : index
    %c0_0 = arith.constant 0 : index
    %0 = vector.load %arg2[%c0, %c0_0] : memref<128x128xf32, #tpu.memory_space<vmem>>, vector<128x128xf32>
    %1 = arith.truncf %0 : vector<128x128xf32> to vector<128x128xbf16>
    %c0_1 = arith.constant 0 : index
    %c0_2 = arith.constant 0 : index
    %2 = vector.load %arg3[%c0_1, %c0_2] : memref<128x256xbf16, #tpu.memory_space<vmem>>, vector<128x256xbf16>
    %cst = arith.constant dense<0.000000e+00> : vector<128x256xf32>
    %3 = tpu.matmul %1, %2, %cst {dimension_numbers = #tpu.dot_dimension_numbers<[1], [0], [0], [1], [0, 0, 1, 1], [], []>} : vector<128x128xbf16>, vector<128x256xbf16>, vector<128x256xf32> -> vector<128x256xf32>
    %c0_3 = arith.constant 0 : index
    %c0_4 = arith.constant 0 : index
    %4 = vector.load %arg4[%c0_3, %c0_4] : memref<1x256xf32, #tpu.memory_space<vmem>>, vector<1x256xf32>
    %5 = vector.broadcast %4 : vector<1x256xf32> to vector<128x256xf32>
    %6 = arith.addf %3, %5 : vector<128x256xf32>
    %7 = arith.truncf %6 : vector<128x256xf32> to vector<128x256xbf16>
    %c0_5 = arith.constant 0 : index
    %c0_6 = arith.constant 0 : index
    %8 = vector.load %arg5[%c0_5, %c0_6] : memref<128x256xbf16, #tpu.memory_space<vmem>>, vector<128x256xbf16>
    tpu.vector_store %arg5[%c0_5, %c0_6], %7 {strides = array<i32>} : memref<128x256xbf16, #tpu.memory_space<vmem>>, vector<128x256xbf16>,
    return
  }
  func.func @transform_0(%arg0: i32, %arg1: i32) -> (i32, i32) {
    %c0_i32 = arith.constant 0 : i32
    %c0_i32_0 = arith.constant 0 : i32
    return %arg0, %c0_i32 : i32, i32
  }
  func.func @transform_1(%arg0: i32, %arg1: i32) -> (i32, i32) {
    %c0_i32 = arith.constant 0 : i32
    %c0_i32_0 = arith.constant 0 : i32
    return %c0_i32, %arg1 : i32, i32
  }
  func.func @transform_2(%arg0: i32, %arg1: i32) -> (i32, i32) {
    %c0_i32 = arith.constant 0 : i32
    %c0_i32_0 = arith.constant 0 : i32
    return %c0_i32, %arg1 : i32, i32
  }
  func.func @transform_3(%arg0: i32, %arg1: i32) -> (i32, i32) {
    %c0_i32 = arith.constant 0 : i32
    return %arg0, %arg1 : i32, i32
  }
}

</mosaic_0001>

<bundles_post_ra>
// kernel: tpu_custom_call.1
= control target key start
LH: loop header
LB: loop body
LE: loop exit
PB: predicated region body
PF: predicated region fallthrough
CT: control target
= control target key end

     0   :  { %8 = vsyncpa [#allocation3], 0  ;;  %s623_s0 = inlined_call_operand.hbm [shape: f32[128,128], index: 0, kind: input, shape index: {}]   ;;  %s624_s1 = inlined_call_operand.hbm [shape: bf16[128,256], index: 1, kind: input, shape index: {}]   ;;  %s625_s2 = inlined_call_operand.hbm [shape: f32[1,256], index: 2, kind: input, shape index: {}]   ;;  %s626_s3 = inlined_call_operand.hbm [shape: bf16[128,256], index: 3, kind: output, shape index: {}]  }
   0x1   :  { %9 = vsyncpa [#allocation6], 0 }
   0x2   :  { %10 = vsyncpa [#allocation4], 0  ;;  %s28_s14 = sshll.u32 %s624_s1, 4  ;;  %s540_s15 = smov [#allocation5]   ;;  %s29_s14 = int_to_ptr.hbm [resolvable:$true] %s28_s14 }
   0x3   :  { %s30_s16 = sshll.u32 %s540_s15, 4  ;;  %s15_s19 = sshll.u32 %s623_s0, 4  ;;  %s31_s16 = int_to_ptr.vmem [resolvable:$true] %s30_s16  ;;  %s16_s19 = int_to_ptr.hbm [resolvable:$true] %s15_s19 }
   0x4   :  { %s541_s20 = smov 128   ;;  %s542_s21 = smov 8  }
   0x5   :  { %36 = dma.hbm_to_vmem [thread:$0]  %s29_s14, 2048, %s31_s16, [#allocation6], %s541_s20, %s541_s20, %s542_s21  }
   0x6   :  { %s543_s22 = smov [#allocation2]   ;;  %s42_s1 = sshll.u32 %s625_s2, 4  ;;  %s43_s1 = int_to_ptr.hbm [resolvable:$true] %s42_s1 }
   0x7   :  { %s17_s23 = sshll.u32 %s543_s22, 4  ;;  %s544_s0 = smov [#allocation7]   ;;  %s18_s23 = int_to_ptr.vmem [resolvable:$true] %s17_s23 }
   0x8   :  { %23 = dma.hbm_to_vmem [thread:$0]  %s16_s19, 2048, %s18_s23, [#allocation3], %s541_s20, %s541_s20, %s542_s21  }
   0x9   :  { %s44_s26 = sshll.u32 %s544_s0, 4  ;;  %s45_s26 = int_to_ptr.vmem [resolvable:$true] %s44_s26 }
   0xa   :  { %47 = dma.hbm_to_vmem [thread:$0]  %s43_s1, 32, %s45_s26, [#allocation6]  }
   0xb   :  { %534 = dma.done.wait [#allocation3], 2048  }
   0xc   :  { %535 = vsyncadd [#allocation3], 4294965248 }
   0xd   :  { %536 = dma.done.wait [#allocation6], 2080  }
   0xe   :  { %537 = vsyncadd [#allocation6], 4294965216  ;;  %v394_v0 = vld [vmem:[#allocation5 + $0x70] sm:$0xf]  ;;  %v415_v1 = vld [vmem:[#allocation5 + $0x74] sm:$0xf0] }
   0xf   :  { %v414_v2 = vld [vmem:[#allocation5 + $0x74] sm:$0xf]  ;;  %v395_v3 = vor.u32 %v415_v1, %v394_v0  ;;  %v396_v4 = vld [vmem:[#allocation5 + $0x78] sm:$0xf0]  ;;  %v386_v5 = vld [vmem:[#allocation5 + $0x60] sm:$0xf] }
  0x10   :  { %v413_v6 = vld [vmem:[#allocation5 + $0x64] sm:$0xf0]  ;;  %v399_v7 = vor.u32 %v414_v2, %v396_v4  ;;  %v412_v8 = vld [vmem:[#allocation5 + $0x64] sm:$0xf]  ;;  %v388_v9 = vld [vmem:[#allocation5 + $0x68] sm:$0xf0] }
  0x11   :  { %186 = vmatpush.bf16.msra.mxu0 %v395_v3  ;;  %416 = vmatpush.bf16.msra.mxu2 %v395_v3  ;;  %v387_v10 = vor.u32 %v413_v6, %v386_v5  ;;  %v391_v11 = vor.u32 %v412_v8, %v388_v9  ;;  %v378_v12 = vld [vmem:[#allocation5 + $0x50] sm:$0xf]  ;;  %v411_v13 = vld [vmem:[#allocation5 + $0x54] sm:$0xf0]  ;;  %v410_v14 = vld [vmem:[#allocation5 + $0x54] sm:$0xf] }
  0x12   :  { %235 = vmatpush.bf16.msra.mxu1 %v399_v7  ;;  %424 = vmatpush.bf16.msra.mxu3 %v399_v7  ;;  %v380_v15 = vld [vmem:[#allocation5 + $0x58] sm:$0xf0]  ;;  %v379_v16 = vor.u32 %v411_v13, %v378_v12  ;;  %v370_v18 = vld [vmem:[#allocation5 + $0x40] sm:$0xf]  ;;  %v409_v19 = vld [vmem:[#allocation5 + $0x44] sm:$0xf0] }
  0x13   :  { %v383_v17 = vor.u32 %v410_v14, %v380_v15  ;;  %v408_v20 = vld [vmem:[#allocation5 + $0x44] sm:$0xf]  ;;  %v372_v21 = vld [vmem:[#allocation5 + $0x48] sm:$0xf0]  ;;  %v371_v22 = vor.u32 %v409_v19, %v370_v18  ;;  %v362_v24 = vld [vmem:[#allocation5 + $0x30] sm:$0xf] }
  0x14   :  { %v375_v23 = vor.u32 %v408_v20, %v372_v21  ;;  %v407_v25 = vld [vmem:[#allocation5 + $0x34] sm:$0xf0]  ;;  %v406_v26 = vld [vmem:[#allocation5 + $0x34] sm:$0xf]  ;;  %v364_v27 = vld [vmem:[#allocation5 + $0x38] sm:$0xf0] }
  0x15   :  { %187 = vmatpush.bf16.msra.mxu0 %v387_v10  ;;  %417 = vmatpush.bf16.msra.mxu2 %v387_v10  ;;  %v363_v28 = vor.u32 %v407_v25, %v362_v24  ;;  %v367_v29 = vor.u32 %v406_v26, %v364_v27  ;;  %v354_v30 = vld [vmem:[#allocation5 + $0x20] sm:$0xf]  ;;  %v405_v31 = vld [vmem:[#allocation5 + $0x24] sm:$0xf0]  ;;  %v404_v32 = vld [vmem:[#allocation5 + $0x24] sm:$0xf] }
  0x16   :  { %236 = vmatpush.bf16.msra.mxu1 %v391_v11  ;;  %425 = vmatpush.bf16.msra.mxu3 %v391_v11  ;;  %v356_v33 = vld [vmem:[#allocation5 + $0x28] sm:$0xf0]  ;;  %v355_v34 = vor.u32 %v405_v31, %v354_v30  ;;  %v346_v36 = vld [vmem:[#allocation5 + $0x10] sm:$0xf]  ;;  %v403_v37 = vld [vmem:[#allocation5 + $0x14] sm:$0xf0] }
  0x17   :  { %v359_v35 = vor.u32 %v404_v32, %v356_v33  ;;  %v402_v38 = vld [vmem:[#allocation5 + $0x14] sm:$0xf]  ;;  %v348_v39 = vld [vmem:[#allocation5 + $0x18] sm:$0xf0]  ;;  %v347_v40 = vor.u32 %v403_v37, %v346_v36  ;;  %v338_v42 = vld [vmem:[#allocation5] sm:$0xf] }
  0x18   :  { %v351_v41 = vor.u32 %v402_v38, %v348_v39  ;;  %v401_v43 = vld [vmem:[#allocation5 + $0x4] sm:$0xf0]  ;;  %v400_v44 = vld [vmem:[#allocation5 + $0x4] sm:$0xf]  ;;  %v340_v45 = vld [vmem:[#allocation5 + $0x8] sm:$0xf0] }
  0x19   :  { %188 = vmatpush.bf16.msra.mxu0 %v379_v16  ;;  %418 = vmatpush.bf16.msra.mxu2 %v379_v16  ;;  %v60_v46 = vld [vmem:[#allocation2] sm:$0xff]  ;;  %v339_v47 = vor.u32 %v401_v43, %v338_v42  ;;  %v61_v48 = vld [vmem:[#allocation2 + $0x8] sm:$0xff]  ;;  %v343_v51 = vor.u32 %v400_v44, %v340_v45  ;;  %v62_v54 = vld [vmem:[#allocation2 + $0x10] sm:$0xff]  ;;  %s545_s2 = smov [#allocation8]   ;;  %s322_s30 = sshll.u32 %s626_s3, 4  ;;  %s323_s30 = int_to_ptr.hbm [resolvable:$true] %s322_s30 }
  0x1a   :  { %237 = vmatpush.bf16.msra.mxu1 %v383_v17  ;;  %426 = vmatpush.bf16.msra.mxu3 %v383_v17  ;;  %v68_v49 = vld [vmem:[#allocation2 + $0x40] sm:$0xff]  ;;  %v69_v50 = vld [vmem:[#allocation2 + $0x48] sm:$0xff]  ;;  %v76_v52 = vpack.c.bf16 %v61_v48, %v60_v46  ;;  %v63_v55 = vld [vmem:[#allocation2 + $0x18] sm:$0xff]  ;;  %s320_s27 = sshll.u32 %s545_s2, 4  ;;  %s321_s27 = int_to_ptr.vmem [resolvable:$true] %s320_s27 }
  0x1b   :  { %v80_v53 = vpack.c.bf16 %v69_v50, %v68_v49  ;;  %v70_v56 = vld [vmem:[#allocation2 + $0x50] sm:$0xff]  ;;  %v71_v57 = vld [vmem:[#allocation2 + $0x58] sm:$0xff]  ;;  %v77_v58 = vpack.c.bf16 %v63_v55, %v62_v54  ;;  %v64_v60 = vld [vmem:[#allocation2 + $0x20] sm:$0xff] }
  0x1c   :  { %v81_v59 = vpack.c.bf16 %v71_v57, %v70_v56  ;;  %v65_v61 = vld [vmem:[#allocation2 + $0x28] sm:$0xff]  ;;  %v72_v62 = vld [vmem:[#allocation2 + $0x60] sm:$0xff]  ;;  %v66_v2 = vld [vmem:[#allocation2 + $0x30] sm:$0xff] }
  0x1d   :  { %189 = vmatpush.bf16.msra.mxu0 %v371_v22  ;;  %419 = vmatpush.bf16.msra.mxu2 %v371_v22  ;;  %v73_v63 = vld [vmem:[#allocation2 + $0x68] sm:$0xff]  ;;  %v78_v0 = vpack.c.bf16 %v65_v61, %v64_v60  ;;  %v67_v3 = vld [vmem:[#allocation2 + $0x38] sm:$0xff]  ;;  %v74_v4 = vld [vmem:[#allocation2 + $0x70] sm:$0xff] }
  0x1e   :  { %238 = vmatpush.bf16.msra.mxu1 %v375_v23  ;;  %427 = vmatpush.bf16.msra.mxu3 %v375_v23  ;;  %v82_v1 = vpack.c.bf16 %v73_v63, %v72_v62  ;;  %v75_v5 = vld [vmem:[#allocation2 + $0x78] sm:$0xff]  ;;  %v79_v6 = vpack.c.bf16 %v67_v3, %v66_v2  ;;  %v100_v8 = vld [vmem:[#allocation7] sm:$0x3] }
  0x1f   :  { %v83_v7 = vpack.c.bf16 %v75_v5, %v74_v4  ;;  %v581_v9 = vperm.slane %v100_v8, 0  ;;  %v583_v10 = vperm.slane %v100_v8, 1 }
  0x21   :  { %190 = vmatpush.bf16.msra.mxu0 %v363_v28  ;;  %420 = vmatpush.bf16.msra.mxu2 %v363_v28 }
  0x22   :  { %239 = vmatpush.bf16.msra.mxu1 %v367_v29  ;;  %428 = vmatpush.bf16.msra.mxu3 %v367_v29 }
  0x25   :  { %191 = vmatpush.bf16.msra.mxu0 %v355_v34  ;;  %421 = vmatpush.bf16.msra.mxu2 %v355_v34 }
  0x26   :  { %240 = vmatpush.bf16.msra.mxu1 %v359_v35  ;;  %429 = vmatpush.bf16.msra.mxu3 %v359_v35 }
  0x29   :  { %192 = vmatpush.bf16.msra.mxu0 %v347_v40  ;;  %422 = vmatpush.bf16.msra.mxu2 %v347_v40 }
  0x2a   :  { %241 = vmatpush.bf16.msra.mxu1 %v351_v41  ;;  %430 = vmatpush.bf16.msra.mxu3 %v351_v41 }
  0x2d   :  { %193 = vmatpush.bf16.msra.mxu0 %v339_v47  ;;  %423 = vmatpush.bf16.msra.mxu2 %v339_v47 }
  0x2e   :  { %242 = vmatpush.bf16.msra.mxu1 %v343_v51  ;;  %431 = vmatpush.bf16.msra.mxu3 %v343_v51 }
  0x30   :  { %194 = vmatmul.bf16.vlgmr.msra.gmra.mxu0 %v76_v52  ;;  %214 = vmatmul.bf16.vlgmr.msra.gmra.mxu2 %v80_v53 }
  0x31   :  { %243 = vmatmul.bf16.vlgmr.msra.gmra.mxu1 %v76_v52  ;;  %263 = vmatmul.bf16.vlgmr.msra.gmra.mxu3 %v80_v53 }
  0x40   :  { %199 = vmatmul.bf16.gmra.mxu0 %v77_v58  ;;  %219 = vmatmul.bf16.gmra.mxu2 %v81_v59 }
  0x41   :  { %248 = vmatmul.bf16.gmra.mxu1 %v77_v58  ;;  %268 = vmatmul.bf16.gmra.mxu3 %v81_v59 }
  0x50   :  { %204 = vmatmul.bf16.gmra.mxu0 %v78_v0  ;;  %224 = vmatmul.bf16.gmra.mxu2 %v82_v1 }
  0x51   :  { %253 = vmatmul.bf16.gmra.mxu1 %v78_v0  ;;  %273 = vmatmul.bf16.gmra.mxu3 %v82_v1 }
  0x60   :  { %209 = vmatmul.bf16.gmra.mxu0 %v79_v6  ;;  %229 = vmatmul.bf16.gmra.mxu2 %v83_v7 }
  0x61   :  { %258 = vmatmul.bf16.gmra.mxu1 %v79_v6  ;;  %278 = vmatmul.bf16.gmra.mxu3 %v83_v7 }
  0xad   :  { %v195_v11 = vpop.f32.mrf.mxu0 }
  0xae   :  { %v196_v12 = vadd.f32 %v195_v11, %v581_v9  ;;  %v244_v13 = vpop.f32.mrf.mxu1 }
  0xaf   :  { %v245_v14 = vadd.f32 %v244_v13, %v583_v10 }
  0xb1   :  { %v284_v15 = vpack.c.bf16 %v245_v14, %v196_v12 }
  0xb3   :  { %300 = vst [vmem:[#allocation8] sm:$0xff] %v284_v15  ;;  %v215_v16 = vpop.f32.mrf.mxu2 }
  0xb4   :  { %v216_v17 = vadd.f32 %v215_v16, %v581_v9  ;;  %v264_v18 = vpop.f32.mrf.mxu3 }
  0xb5   :  { %v265_v19 = vadd.f32 %v264_v18, %v583_v10  ;;  %v197_v20 = vpop.f32.mrf.mxu0 }
  0xb6   :  { %v198_v21 = vadd.f32 %v197_v20, %v581_v9  ;;  %v246_v22 = vpop.f32.mrf.mxu1 }
  0xb7   :  { %v292_v23 = vpack.c.bf16 %v265_v19, %v216_v17  ;;  %v247_v24 = vadd.f32 %v246_v22, %v583_v10 }
  0xb9   :  { %308 = vst [vmem:[#allocation8 + $0x40] sm:$0xff] %v292_v23  ;;  %v285_v25 = vpack.c.bf16 %v247_v24, %v198_v21 }
  0xbb   :  { %301 = vst [vmem:[#allocation8 + $0x8] sm:$0xff] %v285_v25  ;;  %v217_v26 = vpop.f32.mrf.mxu2 }
  0xbc   :  { %v218_v27 = vadd.f32 %v217_v26, %v581_v9  ;;  %v266_v28 = vpop.f32.mrf.mxu3 }
  0xbd   :  { %v267_v29 = vadd.f32 %v266_v28, %v583_v10  ;;  %v200_v30 = vpop.f32.mrf.mxu0 }
  0xbe   :  { %v201_v31 = vadd.f32 %v200_v30, %v581_v9  ;;  %v249_v32 = vpop.f32.mrf.mxu1 }
  0xbf   :  { %v293_v33 = vpack.c.bf16 %v267_v29, %v218_v27  ;;  %v250_v34 = vadd.f32 %v249_v32, %v583_v10 }
  0xc1   :  { %309 = vst [vmem:[#allocation8 + $0x48] sm:$0xff] %v293_v33  ;;  %v286_v35 = vpack.c.bf16 %v250_v34, %v201_v31 }
  0xc3   :  { %302 = vst [vmem:[#allocation8 + $0x10] sm:$0xff] %v286_v35  ;;  %v220_v36 = vpop.f32.mrf.mxu2 }
  0xc4   :  { %v221_v37 = vadd.f32 %v220_v36, %v581_v9  ;;  %v269_v38 = vpop.f32.mrf.mxu3 }
  0xc5   :  { %v270_v39 = vadd.f32 %v269_v38, %v583_v10  ;;  %v202_v40 = vpop.f32.mrf.mxu0 }
  0xc6   :  { %v203_v41 = vadd.f32 %v202_v40, %v581_v9  ;;  %v251_v42 = vpop.f32.mrf.mxu1 }
  0xc7   :  { %v294_v43 = vpack.c.bf16 %v270_v39, %v221_v37  ;;  %v252_v44 = vadd.f32 %v251_v42, %v583_v10 }
  0xc9   :  { %310 = vst [vmem:[#allocation8 + $0x50] sm:$0xff] %v294_v43  ;;  %v287_v45 = vpack.c.bf16 %v252_v44, %v203_v41 }
  0xcb   :  { %303 = vst [vmem:[#allocation8 + $0x18] sm:$0xff] %v287_v45  ;;  %v222_v46 = vpop.f32.mrf.mxu2 }
  0xcc   :  { %v223_v47 = vadd.f32 %v222_v46, %v581_v9  ;;  %v271_v48 = vpop.f32.mrf.mxu3 }
  0xcd   :  { %v272_v49 = vadd.f32 %v271_v48, %v583_v10  ;;  %v205_v50 = vpop.f32.mrf.mxu0 }
  0xce   :  { %v206_v51 = vadd.f32 %v205_v50, %v581_v9  ;;  %v254_v52 = vpop.f32.mrf.mxu1 }
  0xcf   :  { %v295_v53 = vpack.c.bf16 %v272_v49, %v223_v47  ;;  %v255_v54 = vadd.f32 %v254_v52, %v583_v10 }
  0xd1   :  { %311 = vst [vmem:[#allocation8 + $0x58] sm:$0xff] %v295_v53  ;;  %v288_v55 = vpack.c.bf16 %v255_v54, %v206_v51 }
  0xd3   :  { %304 = vst [vmem:[#allocation8 + $0x20] sm:$0xff] %v288_v55  ;;  %v225_v56 = vpop.f32.mrf.mxu2 }
  0xd4   :  { %v226_v57 = vadd.f32 %v225_v56, %v581_v9  ;;  %v274_v58 = vpop.f32.mrf.mxu3 }
  0xd5   :  { %v275_v59 = vadd.f32 %v274_v58, %v583_v10  ;;  %v207_v60 = vpop.f32.mrf.mxu0 }
  0xd6   :  { %v208_v61 = vadd.f32 %v207_v60, %v581_v9  ;;  %v256_v62 = vpop.f32.mrf.mxu1 }
  0xd7   :  { %v296_v63 = vpack.c.bf16 %v275_v59, %v226_v57  ;;  %v257_v0 = vadd.f32 %v256_v62, %v583_v10 }
  0xd9   :  { %312 = vst [vmem:[#allocation8 + $0x60] sm:$0xff] %v296_v63  ;;  %v289_v1 = vpack.c.bf16 %v257_v0, %v208_v61 }
  0xdb   :  { %305 = vst [vmem:[#allocation8 + $0x28] sm:$0xff] %v289_v1  ;;  %v227_v2 = vpop.f32.mrf.mxu2 }
  0xdc   :  { %v228_v3 = vadd.f32 %v227_v2, %v581_v9  ;;  %v276_v4 = vpop.f32.mrf.mxu3 }
  0xdd   :  { %v277_v5 = vadd.f32 %v276_v4, %v583_v10  ;;  %v210_v6 = vpop.f32.mrf.mxu0 }
  0xde   :  { %v211_v7 = vadd.f32 %v210_v6, %v581_v9  ;;  %v259_v8 = vpop.f32.mrf.mxu1 }
  0xdf   :  { %v297_v11 = vpack.c.bf16 %v277_v5, %v228_v3  ;;  %v260_v12 = vadd.f32 %v259_v8, %v583_v10 }
  0xe1   :  { %313 = vst [vmem:[#allocation8 + $0x68] sm:$0xff] %v297_v11  ;;  %v290_v13 = vpack.c.bf16 %v260_v12, %v211_v7 }
  0xe3   :  { %306 = vst [vmem:[#allocation8 + $0x30] sm:$0xff] %v290_v13  ;;  %v230_v14 = vpop.f32.mrf.mxu2 }
  0xe4   :  { %v231_v15 = vadd.f32 %v230_v14, %v581_v9  ;;  %v279_v16 = vpop.f32.mrf.mxu3 }
  0xe5   :  { %v280_v17 = vadd.f32 %v279_v16, %v583_v10  ;;  %v212_v18 = vpop.f32.mrf.mxu0 }
  0xe6   :  { %v213_v19 = vadd.f32 %v212_v18, %v581_v9  ;;  %v261_v20 = vpop.f32.mrf.mxu1 }
  0xe7   :  { %v298_v21 = vpack.c.bf16 %v280_v17, %v231_v15  ;;  %v262_v22 = vadd.f32 %v261_v20, %v583_v10 }
  0xe9   :  { %314 = vst [vmem:[#allocation8 + $0x70] sm:$0xff] %v298_v21  ;;  %v291_v23 = vpack.c.bf16 %v262_v22, %v213_v19 }
  0xeb   :  { %307 = vst [vmem:[#allocation8 + $0x38] sm:$0xff] %v291_v23  ;;  %v232_v24 = vpop.f32.mrf.mxu2 }
  0xec   :  { %v233_v25 = vadd.f32 %v232_v24, %v581_v9  ;;  %v281_v26 = vpop.f32.mrf.mxu3 }
  0xed   :  { %v282_v27 = vadd.f32 %v281_v26, %v583_v10 }
  0xef   :  { %v299_v28 = vpack.c.bf16 %v282_v27, %v233_v25 }
  0xf1   :  { %315 = vst [vmem:[#allocation8 + $0x78] sm:$0xff] %v299_v28 }
  0xf2   :  { %328 = dma.vmem_to_hbm [thread:$0]  %s321_s27, 2048, %s323_s30, [#allocation4], %s541_s20, %s541_s20, %s542_s21  }
  0xf3   :  { %538 = dma.done.wait [#allocation4], 2048  }
  0xf4   :  { %539 = vsyncadd [#allocation4], 4294965248 }
  0xf5   :  { %333 = vsyncpa [#allocation3], 1 }
  0xf6   :  { %334 = vsyncpa [#allocation6], 1 }
  0xf7   :  { %335 = vsyncpa [#allocation4], 1 }

</bundles_post_ra>
